<compile_context>
chip_gen: v6e
topology: v6e:2x2x1
jax: 0.10.0
libtpu: 0.0.40
codegen_flags: <defaults>
</compile_context>

<pallas_src>
import functools

import jax
import jax.numpy as jnp
from jax import lax
from jax.experimental import pallas as pl
from jax.experimental.pallas import tpu as pltpu

EPS = 1e-5
DOT_DTYPE = jnp.bfloat16     # MXU operand dtype; accum / BN math stays f32.


def _vmem_limit_bytes():
    """Generation-aware scoped-VMEM budget (v7x has 64 MiB physical, not 128)."""
    cap = 128 * 1024 * 1024
    try:
        cap = int(pltpu.get_tpu_info().vmem_capacity_bytes)
    except Exception:
        pass
    return int(min(max(cap // 2, 16 * 1024 * 1024), 64 * 1024 * 1024))


# ---------------------------------------------------------------------------
# In-kernel helpers
# ---------------------------------------------------------------------------
def _partial_stats(accv):
    """One (2, W*C) value: row 0 = sum, row 1 = sum of squares (single store)."""
    row = lax.broadcasted_iota(jnp.int32, (2, 1), 0)
    return jnp.where(row == 0,
                     jnp.sum(accv, axis=0, keepdims=True),
                     jnp.sum(accv * accv, axis=0, keepdims=True))


def _conv3_banded(src_ref, w_ref, m_out):
    """3x3 'same' conv as 3 MXU pushes over the stacked padded slab."""
    acc = jnp.dot(src_ref[0:m_out, :], w_ref[0],
                  preferred_element_type=jnp.float32)
    acc = acc + jnp.dot(src_ref[1:m_out + 1, :], w_ref[1],
                        preferred_element_type=jnp.float32)
    acc = acc + jnp.dot(src_ref[2:m_out + 2, :], w_ref[2],
                        preferred_element_type=jnp.float32)
    return acc


def conv_stats_kernel(x_ref, w_ref, y_ref, stats_ref, *, H, Wcout):
    """conv1 over a stacked padded slab + masked partial BN1 stats.

    x_ref : (BM, (W+2)*Cin) bf16, BM = N_blk*(H+2); per image the slab rows are
            [zero, H interior rows, zero] and both halo columns sit at the tail.
    y_ref : (BM, (W+2)*C1) f32, written in the same padded-row convention
            (valid rows at slab offsets 1..H); pad rows / halo cols are left
            unwritten junk and are masked by the consumer.
    """
    BM = x_ref.shape[0]
    M = BM - 2
    acc = _conv3_banded(x_ref, w_ref, M)

    # acc row r is a real output iff r % (H+2) < H (rows in between are the
    # junk windows that straddle two stacked images).
    r = lax.broadcasted_iota(jnp.int32, (M, 1), 0) % (H + 2)
    accv = jnp.where(r < H, acc, 0.0)
    stats_ref[...] = _partial_stats(accv)

    # Lane-aligned store (col offset 0); the +1 row offset puts outputs at slab
    # offsets 1..H so kernel B can use this buffer directly as conv2's padded
    # input rows without re-copying the interior.
    y_ref[1:M + 1, 0:Wcout] = acc


def bn_relu_conv_stats_kernel(y1_ref, scale_ref, shift_ref, w_ref,
                              y2_ref, stats_ref, a_ref, *, H, Wcin):
    """BN1-apply + ReLU (f32), conv2 (bf16 MXU), masked partial BN2 stats.

    y1_ref : (BM, (W+2)*C1) f32, padded-row layout from kernel A.
    a_ref  : (BM, (W+2)*C1) bf16 scratch: masked BN+ReLU activation with pad
             rows / junk rows / halo cols forced to zero = conv2's padded slab.
             (Unwritten junk in y1 is harmless: it is masked out by `interior`.)
    """
    BM, KP = y1_ref.shape
    M = BM - 2

    a = jnp.maximum(y1_ref[...] * scale_ref[...] + shift_ref[...], 0.0)
    p = lax.broadcasted_iota(jnp.int32, (BM, 1), 0) % (H + 2)
    c = lax.broadcasted_iota(jnp.int32, (1, KP), 1)
    interior = (p >= 1) & (p <= H) & (c < Wcin)
    a_ref[...] = jnp.where(interior, a, 0.0).astype(a_ref.dtype)

    acc = _conv3_banded(a_ref, w_ref, M)

    r = lax.broadcasted_iota(jnp.int32, (M, 1), 0) % (H + 2)
    accv = jnp.where(r < H, acc, 0.0)
    stats_ref[...] = _partial_stats(accv)

    y2_ref[0:M, :] = acc


# ---------------------------------------------------------------------------
# Wrapper-side glue
# ---------------------------------------------------------------------------
def _band_weight(w_hwio, W, dtype):
    """[3,3,Cin,Cout] HWIO -> banded [3, (W+2)*Cin, W*Cout] built against the
    reordered folded column layout [interior pixels 0..W-1 | left halo | right
    halo]: band[ky, pos(wo+kx-1)*Cin+ci, wo*Cout+co] = w[ky, kx, ci, co]."""
    kh, kw, Cin, Cout = w_hwio.shape
    x = jnp.arange(W)[None, :] + jnp.arange(kw)[:, None] - (kw // 2)   # (kw, W)
    pos = jnp.where(x < 0, W, jnp.where(x >= W, W + 1, x))
    sel = (jnp.arange(W + kw - 1)[None, :, None] == pos[:, None, :])
    band = jnp.einsum('yxio,xab->yaibo', w_hwio.astype(jnp.float32),
                      sel.astype(jnp.float32), precision=lax.Precision.HIGHEST)
    return band.reshape(kh, (W + kw - 1) * Cin, W * Cout).astype(dtype)


def _finalize_bn(stats, gamma, beta, count, W):
    """Phase 2: fold per-block partial sums into per-channel BN scale/shift
    (training-mode BN: biased variance)."""
    C = gamma.shape[0]
    s = jnp.sum(stats[:, 0, :], axis=0).reshape(W, C).sum(axis=0)
    sq = jnp.sum(stats[:, 1, :], axis=0).reshape(W, C).sum(axis=0)
    mean = s / count
    var = jnp.maximum(sq / count - mean * mean, 0.0)
    scale = gamma * lax.rsqrt(var + EPS)
    shift = beta - mean * scale
    return scale, shift


def _pick_block_images(N, H, target_rows=128):
    """Largest images-per-step whose stacked padded rows fill the MXU M target
    and satisfy the (8,128) block-shape constraint on the row axis."""
    rows = H + 2
    cap = max(1, target_rows // rows)
    valid = [d for d in range(1, N + 1)
             if N % d == 0 and (d == N or (d * rows) % 8 == 0)]
    under = [d for d in valid if d <= cap]
    return max(under) if under else min(valid)


def double_conv(x_nchw, w1, g1, b1, w2, g2, b2):
    """x_nchw: [N, Cin, H, W]; w1: [3,3,Cin,C1]; w2: [3,3,C1,C2]; g/b: [C]."""
    N, Cin, H, W = x_nchw.shape
    C1, C2 = w1.shape[-1], w2.shape[-1]
    KP1, KP2 = (W + 2) * Cin, (W + 2) * C1          # folded padded row widths
    WC1, WC2 = W * C1, W * C2

    n_blk = _pick_block_images(N, H)
    n_blocks = N // n_blk
    BM = n_blk * (H + 2)                            # stacked padded rows / step
    rows = N * (H + 2)

    # NCHW -> NHWC, fold (W, C) into the lane axis.  Reordered padded layout
    # [interior | halos] makes pre-padding one trailing jnp.pad and keeps all
    # kernel stores lane-aligned at offset 0 (perf review items 1 & 2).
    x = jnp.transpose(x_nchw, (0, 2, 3, 1)).astype(jnp.float32)
    x = x.reshape(N, H, W * Cin)
    xpad = jnp.pad(x, ((0, 0), (1, 1), (0, 2 * Cin)))            # (N, H+2, KP1)
    xpad = xpad.reshape(rows, KP1).astype(DOT_DTYPE)

    wband1 = _band_weight(w1, W, DOT_DTYPE)          # (3, KP1, WC1) bf16
    wband2 = _band_weight(w2, W, DOT_DTYPE)          # (3, KP2, WC2) bf16

    cparams = pltpu.CompilerParams(dimension_semantics=("parallel",),
                                   vmem_limit_bytes=_vmem_limit_bytes())

    # ---- kernel A: conv1 + partial BN1 stats -------------------------------
    y1p, stats1 = pl.pallas_call(
        functools.partial(conv_stats_kernel, H=H, Wcout=WC1),
        grid=(n_blocks,),
        in_specs=[
            pl.BlockSpec((BM, KP1), lambda n: (n, 0)),
            pl.BlockSpec(wband1.shape, lambda n: (0, 0, 0)),
        ],
        out_specs=[
            pl.BlockSpec((BM, KP2), lambda n: (n, 0)),
            pl.BlockSpec((None, 2, WC1), lambda n: (n, 0, 0)),
        ],
        out_shape=[
            jax.ShapeDtypeStruct((rows, KP2), jnp.float32),
            jax.ShapeDtypeStruct((n_blocks, 2, WC1), jnp.float32),
        ],
        compiler_params=cparams,
    )(xpad, wband1)
    # TODO(synk): single-buffer the grid-invariant wband/scale/shift operands
    # (pipeline_mode=pl.Buffered(1)) once W / batch blocks grow enough for the
    # duplicated VMEM buffer to matter on v7x's 64 MiB.

    scale1, shift1 = _finalize_bn(stats1, g1.astype(jnp.float32),
                                  b1.astype(jnp.float32), N * H * W, W)
    scale1_t = jnp.tile(scale1, W + 2).reshape(1, KP2)
    shift1_t = jnp.tile(shift1, W + 2).reshape(1, KP2)

    # ---- kernel B: BN1-apply + ReLU + conv2 + partial BN2 stats ------------
    y2p, stats2 = pl.pallas_call(
        functools.partial(bn_relu_conv_stats_kernel, H=H, Wcin=WC1),
        grid=(n_blocks,),
        in_specs=[
            pl.BlockSpec((BM, KP2), lambda n: (n, 0)),
            pl.BlockSpec((1, KP2), lambda n: (0, 0)),
            pl.BlockSpec((1, KP2), lambda n: (0, 0)),
            pl.BlockSpec(wband2.shape, lambda n: (0, 0, 0)),
        ],
        out_specs=[
            pl.BlockSpec((BM, WC2), lambda n: (n, 0)),
            pl.BlockSpec((None, 2, WC2), lambda n: (n, 0, 0)),
        ],
        out_shape=[
            jax.ShapeDtypeStruct((rows, WC2), jnp.float32),
            jax.ShapeDtypeStruct((n_blocks, 2, WC2), jnp.float32),
        ],
        scratch_shapes=[pltpu.VMEM((BM, KP2), DOT_DTYPE)],
        compiler_params=cparams,
    )(y1p, scale1_t, shift1_t, wband2)

    # ---- BN2-apply + ReLU fused into the output relayout (plain XLA) -------
    # Kernel C from the previous revision removed per perf review: it moved
    # ~16 KB per dispatch and forced a second relayout pass over the same data.
    scale2, shift2 = _finalize_bn(stats2, g2.astype(jnp.float32),
                                  b2.astype(jnp.float32), N * H * W, W)
    y2 = y2p.reshape(N, H + 2, W, C2)[:, :H]         # drop pad / junk rows
    out = jnp.maximum(y2 * scale2 + shift2, 0.0)
    # TODO(synk): for large H, additionally tile the conv grids over H-row
    # groups with a 1-row halo (lengthens the grid for v7x megacore and keeps
    # block footprints inside the 64 MiB VMEM budget); at W > ~32 also tile the
    # band over output-column groups to keep MXU density and wband VMEM bounded.
    return jnp.transpose(out, (0, 3, 1, 2))          # back to NCHW


def double_conv_ref(x_nchw, w1, g1, b1, w2, g2, b2):
    """Pure-JAX f32 reference (same semantics) for the correctness check."""
    def conv(x, w):
        return lax.conv_general_dilated(
            x, w, window_strides=(1, 1), padding="SAME",
            dimension_numbers=("NHWC", "HWIO", "NHWC"),
            precision=lax.Precision.HIGHEST)

    def bn_relu(y, g, b):
        mean = jnp.mean(y, axis=(0, 1, 2), keepdims=True)
        var = jnp.mean((y - mean) ** 2, axis=(0, 1, 2), keepdims=True)
        out = (y - mean) * lax.rsqrt(var + EPS) * g + b
        return jnp.maximum(out, 0.0)

    x = jnp.transpose(x_nchw, (0, 2, 3, 1)).astype(jnp.float32)
    y = bn_relu(conv(x, w1), g1, b1)
    y = bn_relu(conv(y, w2), g2, b2)
    return jnp.transpose(y, (0, 3, 1, 2))


if __name__ == "__main__":
    # Small shapes consistent with DoubleConv(in_channels=4, out_channels=8).
    N, Cin, H, W = 2, 4, 16, 16
    Cout = 8

    key = jax.random.PRNGKey(0)
    kx, kw1, kw2 = jax.random.split(key, 3)

    x = jax.random.normal(kx, (N, Cin, H, W), dtype=jnp.float32)

    # Conv weights (HWIO); BN params match PyTorch defaults (gamma=1, beta=0).
    w1 = jax.random.normal(kw1, (3, 3, Cin, Cout), dtype=jnp.float32) * 0.1
    w2 = jax.random.normal(kw2, (3, 3, Cout, Cout), dtype=jnp.float32) * 0.1
    g1 = jnp.ones((Cout,), jnp.float32)
    b1 = jnp.zeros((Cout,), jnp.float32)
    g2 = jnp.ones((Cout,), jnp.float32)
    b2 = jnp.zeros((Cout,), jnp.float32)

    out = jax.block_until_ready(double_conv(x, w1, g1, b1, w2, g2, b2))
    ref = double_conv_ref(x, w1, g1, b1, w2, g2, b2)

    assert out.shape == (N, Cout, H, W)
    # bf16 MXU operands -> bf16-appropriate tolerance (per perf review); the
    # BN stats/apply stay f32, so the only error is conv-operand rounding.
    max_err = float(jnp.max(jnp.abs(out - ref)))
    assert jnp.allclose(out, ref, atol=5e-2, rtol=5e-2), (
        f"mismatch vs reference, max abs diff {max_err}")

    print("KERNEL_OK")
</pallas_src>

<mosaic_0001>
module attributes {stable_mosaic.version = 11 : i64} {
  func.func @conv_stats_kernel(%arg0: i32, %arg1: memref<36x72xbf16, #tpu.memory_space<vmem>>, %arg2: memref<3x72x128xbf16, #tpu.memory_space<vmem>>, %arg3: memref<36x144xf32, #tpu.memory_space<vmem>>, %arg4: memref<1x2x128xf32, #tpu.memory_space<vmem>>) attributes {dimension_semantics = [#tpu.dimension_semantics<parallel>], iteration_bounds = array<i64: 1>, scalar_prefetch = 0 : i64, scratch_operands = 0 : i64, tpu.core_type = #tpu.core_type<tc>, window_params = [{transform_indices = @transform_0, window_bounds = array<i64: 36, 72>}, {pipeline_mode = #tpu.pipeline_mode<synchronous>, transform_indices = @transform_1, window_bounds = array<i64: 3, 72, 128>}, {transform_indices = @transform_2, window_bounds = array<i64: 36, 144>}, {transform_indices = @transform_3, window_bounds = array<i64: 1, 2, 128>}]} {
    %c0 = arith.constant 0 : index
    %c0_0 = arith.constant 0 : index
    %0 = vector.load %arg1[%c0, %c0_0] : memref<36x72xbf16, #tpu.memory_space<vmem>>, vector<34x72xbf16>
    %c0_1 = arith.constant 0 : index
    %c0_2 = arith.constant 0 : index
    %c0_3 = arith.constant 0 : index
    %1 = vector.load %arg2[%c0_1, %c0_2, %c0_3] : memref<3x72x128xbf16, #tpu.memory_space<vmem>>, vector<1x72x128xbf16>
    %2 = vector.shape_cast %1 : vector<1x72x128xbf16> to vector<72x128xbf16>
    %cst = arith.constant dense<0.000000e+00> : vector<34x128xf32>
    %3 = tpu.matmul %0, %2, %cst {dimension_numbers = #tpu.dot_dimension_numbers<[1], [0], [0], [1], [0, 0, 1, 1], [], []>} : vector<34x72xbf16>, vector<72x128xbf16>, vector<34x128xf32> -> vector<34x128xf32>
    %c1 = arith.constant 1 : index
    %c0_4 = arith.constant 0 : index
    %4 = vector.load %arg1[%c1, %c0_4] : memref<36x72xbf16, #tpu.memory_space<vmem>>, vector<34x72xbf16>
    %c1_5 = arith.constant 1 : index
    %c0_6 = arith.constant 0 : index
    %c0_7 = arith.constant 0 : index
    %5 = vector.load %arg2[%c1_5, %c0_6, %c0_7] : memref<3x72x128xbf16, #tpu.memory_space<vmem>>, vector<1x72x128xbf16>
    %6 = vector.shape_cast %5 : vector<1x72x128xbf16> to vector<72x128xbf16>
    %cst_8 = arith.constant dense<0.000000e+00> : vector<34x128xf32>
    %7 = tpu.matmul %4, %6, %cst_8 {dimension_numbers = #tpu.dot_dimension_numbers<[1], [0], [0], [1], [0, 0, 1, 1], [], []>} : vector<34x72xbf16>, vector<72x128xbf16>, vector<34x128xf32> -> vector<34x128xf32>
    %8 = arith.addf %3, %7 : vector<34x128xf32>
    %c2 = arith.constant 2 : index
    %c0_9 = arith.constant 0 : index
    %9 = vector.load %arg1[%c2, %c0_9] : memref<36x72xbf16, #tpu.memory_space<vmem>>, vector<34x72xbf16>
    %c2_10 = arith.constant 2 : index
    %c0_11 = arith.constant 0 : index
    %c0_12 = arith.constant 0 : index
    %10 = vector.load %arg2[%c2_10, %c0_11, %c0_12] : memref<3x72x128xbf16, #tpu.memory_space<vmem>>, vector<1x72x128xbf16>
    %11 = vector.shape_cast %10 : vector<1x72x128xbf16> to vector<72x128xbf16>
    %cst_13 = arith.constant dense<0.000000e+00> : vector<34x128xf32>
    %12 = tpu.matmul %9, %11, %cst_13 {dimension_numbers = #tpu.dot_dimension_numbers<[1], [0], [0], [1], [0, 0, 1, 1], [], []>} : vector<34x72xbf16>, vector<72x128xbf16>, vector<34x128xf32> -> vector<34x128xf32>
    %13 = arith.addf %8, %12 : vector<34x128xf32>
    %14 = tpu.iota {dimensions = array<i32: 0>} : vector<34x1xi32>
    %c18_i32 = arith.constant 18 : i32
    %c0_i32 = arith.constant 0 : i32
    %15 = arith.cmpi eq, %c18_i32, %c0_i32 : i32
    %c1_i32 = arith.constant 1 : i32
    %16 = arith.select %15, %c1_i32, %c18_i32 : i32
    %17 = vector.broadcast %16 : i32 to vector<34x1xi32>
    %18 = arith.remsi %14, %17 : vector<34x1xi32>
    %c0_i32_14 = arith.constant 0 : i32
    %19 = vector.broadcast %c0_i32_14 : i32 to vector<34x1xi32>
    %20 = arith.cmpi ne, %18, %19 : vector<34x1xi32>
    %c0_i32_15 = arith.constant 0 : i32
    %21 = vector.broadcast %c0_i32_15 : i32 to vector<34x1xi32>
    %22 = arith.cmpi slt, %18, %21 : vector<34x1xi32>
    %c0_i32_16 = arith.constant 0 : i32
    %23 = arith.cmpi slt, %16, %c0_i32_16 : i32
    %24 = vector.broadcast %23 : i1 to vector<34x1xi1>
    %25 = vector.broadcast %24 : vector<34x1xi1> to vector<34x1xi1>
    %26 = arith.xori %22, %25 : vector<34x1xi1>
    %27 = arith.andi %26, %20 : vector<34x1xi1>
    %28 = vector.broadcast %16 : i32 to vector<34x1xi32>
    %29 = arith.addi %18, %28 : vector<34x1xi32>
    %30 = arith.select %27, %29, %18 : vector<34x1xi1>, vector<34x1xi32>
    %c16_i32 = arith.constant 16 : i32
    %31 = vector.broadcast %c16_i32 : i32 to vector<34x1xi32>
    %32 = arith.cmpi slt, %30, %31 : vector<34x1xi32>
    %cst_17 = arith.constant 0.000000e+00 : f32
    %33 = vector.shape_cast %32 : vector<34x1xi1> to vector<34x1xi1>
    %34 = vector.broadcast %33 : vector<34x1xi1> to vector<34x128xi1>
    %35 = vector.broadcast %cst_17 : f32 to vector<34x128xf32>
    %36 = arith.select %34, %13, %35 : vector<34x128xi1>, vector<34x128xf32>
    %37 = tpu.iota {dimensions = array<i32: 0>} : vector<2x1xi32>
    %c0_i32_18 = arith.constant 0 : i32
    %38 = vector.broadcast %c0_i32_18 : i32 to vector<2x1xi32>
    %39 = arith.cmpi eq, %37, %38 : vector<2x1xi32>
    %cst_19 = arith.constant dense<0.000000e+00> : vector<128xf32>
    %40 = vector.multi_reduction <add>, %36, %cst_19 [0] : vector<34x128xf32> to vector<128xf32>
    %41 = vector.shape_cast %40 : vector<128xf32> to vector<1x128xf32>
    %42 = arith.mulf %36, %36 : vector<34x128xf32>
    %cst_20 = arith.constant dense<0.000000e+00> : vector<128xf32>
    %43 = vector.multi_reduction <add>, %42, %cst_20 [0] : vector<34x128xf32> to vector<128xf32>
    %44 = vector.shape_cast %43 : vector<128xf32> to vector<1x128xf32>
    %45 = vector.shape_cast %39 : vector<2x1xi1> to vector<2x1xi1>
    %46 = vector.broadcast %45 : vector<2x1xi1> to vector<2x128xi1>
    %47 = vector.shape_cast %41 : vector<1x128xf32> to vector<1x128xf32>
    %48 = vector.broadcast %47 : vector<1x128xf32> to vector<2x128xf32>
    %49 = vector.shape_cast %44 : vector<1x128xf32> to vector<1x128xf32>
    %50 = vector.broadcast %49 : vector<1x128xf32> to vector<2x128xf32>
    %51 = arith.select %46, %48, %50 : vector<2x128xi1>, vector<2x128xf32>
    %c0_21 = arith.constant 0 : index
    %c0_22 = arith.constant 0 : index
    %c0_23 = arith.constant 0 : index
    %52 = vector.load %arg4[%c0_21, %c0_22, %c0_23] : memref<1x2x128xf32, #tpu.memory_space<vmem>>, vector<1x2x128xf32>
    %53 = vector.shape_cast %52 : vector<1x2x128xf32> to vector<2x128xf32>
    %54 = vector.shape_cast %51 : vector<2x128xf32> to vector<1x2x128xf32>
    tpu.vector_store %arg4[%c0_21, %c0_22, %c0_23], %54 {strides = array<i32>} : memref<1x2x128xf32, #tpu.memory_space<vmem>>, vector<1x2x128xf32>,
    %c1_24 = arith.constant 1 : index
    %c0_25 = arith.constant 0 : index
    %55 = vector.load %arg3[%c1_24, %c0_25] : memref<36x144xf32, #tpu.memory_space<vmem>>, vector<34x128xf32>
    tpu.vector_store %arg3[%c1_24, %c0_25], %13 {strides = array<i32>} : memref<36x144xf32, #tpu.memory_space<vmem>>, vector<34x128xf32>,
    return
  }
  func.func @transform_0(%arg0: i32) -> (i32, i32) {
    %c0_i32 = arith.constant 0 : i32
    %c0_i32_0 = arith.constant 0 : i32
    return %arg0, %c0_i32 : i32, i32
  }
  func.func @transform_1(%arg0: i32) -> (i32, i32, i32) {
    %c0_i32 = arith.constant 0 : i32
    %c0_i32_0 = arith.constant 0 : i32
    %c0_i32_1 = arith.constant 0 : i32
    %c0_i32_2 = arith.constant 0 : i32
    return %c0_i32, %c0_i32_0, %c0_i32_1 : i32, i32, i32
  }
  func.func @transform_2(%arg0: i32) -> (i32, i32) {
    %c0_i32 = arith.constant 0 : i32
    %c0_i32_0 = arith.constant 0 : i32
    return %arg0, %c0_i32 : i32, i32
  }
  func.func @transform_3(%arg0: i32) -> (i32, i32, i32) {
    %c0_i32 = arith.constant 0 : i32
    %c0_i32_0 = arith.constant 0 : i32
    %c0_i32_1 = arith.constant 0 : i32
    return %arg0, %c0_i32, %c0_i32_0 : i32, i32, i32
  }
}

</mosaic_0001>

<bundles_post_ra>
// kernel: tpu_custom_call.1
= control target key start
LH: loop header
LB: loop body
LE: loop exit
PB: predicated region body
PF: predicated region fallthrough
CT: control target
= control target key end

     0   :  { %9 = vsyncpa [#allocation3], 0  ;;  %s1052_s0 = inlined_call_operand.hbm [shape: bf16[36,72], index: 0, kind: input, shape index: {}]   ;;  %s1053_s1 = inlined_call_operand.hbm [shape: bf16[3,72,128], index: 1, kind: input, shape index: {}]   ;;  %s1054_s2 = inlined_call_operand.hbm [shape: f32[36,144], index: 2, kind: output, shape index: {0}]   ;;  %s1055_s3 = inlined_call_operand.hbm [shape: f32[1,2,128], index: 3, kind: output, shape index: {1}]  }
   0x1   :  { %10 = vsyncpa [#allocation6], 0 }
   0x2   :  { %11 = vsyncpa [#allocation4], 0 }
   0x3   :  { %12 = vsyncpa [#allocation9], 0  ;;  %s872_s12 = smov [#allocation2]  }
   0x4   :  { %s18_s13 = sshll.u32 %s872_s12, 4  ;;  %s19_s13 = int_to_ptr.vmem [resolvable:$true] %s18_s13 }
   0x5   :  { %s792_s14 = scalar_lea.vmem %s19_s13, 320  ;;  %p797_p1 = scmp.lt.s32.totalorder %s19_s13, %s19_s13 }
   0x6   :  { %p793_p0 = scmp.ne.s32.totalorder %s19_s13, %s792_s14  ;;  %p798_p2 = scmp.lt.s32.totalorder %s792_s14, %s792_s14 }
   0x8   :  { %p799_p3 = por %p798_p2, %p797_p1 }
   0xa   :  { %p800_p4 = pnand %p799_p3, %p793_p0 }
   0xc   :  { %803 = shalt.err (!%p800_p4)
}
   0xd   :  { %s873_s15 = smov 64   ;;  %s874_s16 = smov 4  }
   0xe   :  { %24 = dma.hbm_to_vmem [thread:$0]  %s1052_s0, 320, %s19_s13, [#allocation3], %s873_s15, %s873_s15, %s874_s16  }
   0xf   :  { %s875_s19 = smov [#allocation5]  }
  0x10   :  { %s30_s20 = sshll.u32 %s875_s19, 4  ;;  %s31_s20 = int_to_ptr.vmem [resolvable:$true] %s30_s20 }
  0x11   :  { %s812_s21 = scalar_lea.vmem %s31_s20, 1728  ;;  %p817_p6 = scmp.lt.s32.totalorder %s31_s20, %s31_s20 }
  0x12   :  { %p813_p5 = scmp.ne.s32.totalorder %s31_s20, %s812_s21  ;;  %p818_p7 = scmp.lt.s32.totalorder %s812_s21, %s812_s21 }
  0x14   :  { %p819_p8 = por %p818_p7, %p817_p6 }
  0x16   :  { %p820_p9 = pnand %p819_p8, %p813_p5 }
  0x18   :  { %823 = shalt.err (!%p820_p9)
}
  0x19   :  { %36 = dma.hbm_to_vmem [thread:$0]  %s1053_s1, 1728, %s31_s20, [#allocation6], %s873_s15, %s873_s15, %s874_s16  }
  0x1a   :  { %864 = dma.done.wait [#allocation3], 320  }
  0x1b   :  { %865 = vsyncadd [#allocation3], 4294966976 }
  0x1c   :  { %866 = dma.done.wait [#allocation6], 1728  }
  0x1d   :  { %867 = vsyncadd [#allocation6], 4294965568  ;;  %v876_v0 = vmov 0.0   ;;  %vm877_vm0 = vmmov 0   ;;  %vm143_vm1 = vcmask 1043456   ;;  %v766_v5 = vld [vmem:[#allocation5 + $0x3c] sm:$0xff]   ;;  %v419_v46 = vlaneseq }
  0x1e   :  { %668 = vmatprep.subr.bf16.mxu0 %v876_v0  ;;  %690 = vmatprep.subr.bf16.mxu1 %v876_v0  ;;  %v764_v1 = vld [vmem:[#allocation5 + $0x44] ss:$0 sps:$4 sm:$0xff]   ;;  %v765_v2 = vld [vmem:[#allocation5 + $0x20] ss:$0 sps:$4 sm:$0xff]   ;;  %v767_v6 = vld [vmem:[#allocation5 + $0x18] sm:$0xff]   ;;  %vm133_vm3 = vcmask 588800  }
  0x1f   :  { %678 = vmatprep.mubr.msk.bf16.mxu0 %vm877_vm0, %v876_v0  ;;  %700 = vmatprep.mubr.msk.bf16.mxu1 %vm877_vm0, %v876_v0  ;;  %v145_v3 = vsel %vm143_vm1, %v764_v1, 0  ;;  %v241_v4 = vsel %vm143_vm1, %v765_v2, 0  ;;  %v768_v7 = vld [vmem:[#allocation5 + $0x34] sm:$0xff]   ;;  %v44_v9 = vld [vmem:[#allocation2] sm:$0xf]  ;;  %v772_v20 = vld [vmem:[#allocation5 + $0x24] sm:$0xff]  }
  0x20   :  { %669 = vmatpush3.bf16.msra.mxu0 %v145_v3  ;;  %691 = vmatpush3.bf16.msra.mxu1 %v241_v4  ;;  %v769_v8 = vld [vmem:[#allocation5 + $0x10] sm:$0xff]   ;;  %v771_v14 = vld [vmem:[#allocation5 + $0x8] sm:$0xff]   ;;  %vm82_vm2 = vsmask.f32 7424  ;;  %v773_v22 = vld [vmem:[#allocation5] sm:$0xff]   ;;  %vm313_vm4 = vcmask 1046528  }
  0x21   :  { %670 = vmatprep.subr.bf16.mxu0 %v876_v0  ;;  %692 = vmatprep.subr.bf16.mxu1 %v876_v0  ;;  %v920_v10 = vld [vmem:[#allocation2 + $0x4] sm:$0xf]  ;;  %v923_v12 = vld [vmem:[#allocation2 + $0x8] sm:$0xff]   ;;  %v928_v19 = vld [vmem:[#allocation2 + $0x10] ss:$0 sps:$4 sm:$0x33]  }
  0x22   :  { %v615_v11 = vcombine.low %v44_v9, %v920_v10  ;;  %v770_v13 = vld [vmem:[#allocation5 + $0x2c] sm:$0xff]   ;;  %v91_v17 = vshll.u32 %v923_v12, 16  ;;  %v776_v24 = vld [vmem:[#allocation5 + $0x68] ss:$0 sps:$4 sm:$0xff]   ;;  %v95_v26 = vshrl.u32 %v923_v12, 16  ;;  %v99_v27 = vshll.u32 %v928_v19, 16 }
  0x23   :  { %v356_v28 = vsel %vm143_vm1, %v776_v24, 0  ;;  %v777_v29 = vld [vmem:[#allocation5 + $0x60] sm:$0xff]   ;;  %v779_v33 = vld [vmem:[#allocation5 + $0x58] sm:$0xff]   ;;  %v103_v34 = vshrl.u32 %v928_v19, 16  ;;  %v781_v35 = vld [vmem:[#allocation5 + $0x50] sm:$0xff]   ;;  %v315_v42 = vrot.slane %v923_v12, 1 }
  0x24   :  { %671 = vmatpush3.bf16.msra.mxu0 %v766_v5  ;;  %693 = vmatpush3.bf16.msra.mxu1 %v767_v6  ;;  %v84_v15 = vshrl.u32 %v615_v11, 16  ;;  %v86_v16 = vshll.u32 %v615_v11, 16  ;;  %v93_v21 = vrot.slane %v91_v17, 1  ;;  %v101_v31 = vrot.slane %v99_v27, 1  ;;  %v299_v36 = vld [vmem:[#allocation2] sm:$0xe] }
  0x25   :  { %672 = vmatprep.subr.bf16.mxu0 %v876_v0  ;;  %694 = vmatprep.subr.bf16.mxu1 %v876_v0  ;;  %v780_v38 = vld [vmem:[#allocation2 + $0x10] ss:$0 sps:$4 sm:$0x11]   ;;  %v782_v39 = vld [vmem:[#allocation5 + $0x48] sm:$0xff]   ;;  %v635_v40 = vcombine.low %v299_v36, %v920_v10  ;;  %v317_v43 = vrot.slane %v928_v19, 1  ;;  %v975_v47 = vshrl.u32 %v419_v46, 7 }
  0x26   :  { %v88_v18 = vrot.slane %v86_v16, 1  ;;  %v97_v30 = vor.u32 %v95_v26, %v93_v21  ;;  %v105_v37 = vor.u32 %v103_v34, %v101_v31  ;;  %s878_s0 = smov [#allocation7]  }
  0x27   :  { %v314_v41 = vrot.slane %v635_v40, 1  ;;  %v318_v45 = vsel %vm313_vm4, %v315_v42, %v317_v43  ;;  %v422_v48 = vadd.s32 16, %v975_v47  ;;  %v421_v49 = vadd.s32 8, %v975_v47  ;;  %s588_s1 = sshll.u32 %s878_s0, 4  ;;  %s589_s1 = int_to_ptr.vmem [resolvable:$true] %s588_s1 }
  0x28   :  { %673 = vmatpush3.bf16.msra.mxu0 %v768_v7  ;;  %695 = vmatpush3.bf16.msra.mxu1 %v769_v8  ;;  %v89_v23 = vor.u32 %v88_v18, %v84_v15  ;;  %v102_v32 = vsel %vm82_vm2, %v97_v30, %v101_v31  ;;  %v980_v50 = vmul.u32.u64.low 3817748708, %v975_v47  ;;  %v981_v51 = vmul.u32.u64.high 3817748708, %v975_v47, %v980_v50  ;;  %s824_s24 = scalar_lea.vmem %s589_s1, 1280  ;;  %p829_p11 = scmp.lt.s32.totalorder %s589_s1, %s589_s1 }
  0x29   :  { %674 = vmatprep.subr.bf16.mxu0 %v876_v0  ;;  %696 = vmatprep.subr.bf16.mxu1 %v876_v0  ;;  %v316_v44 = vsel %vm313_vm4, %v314_v41, %v315_v42  ;;  %v423_v52 = vadd.s32 24, %v975_v47  ;;  %v984_v53 = vmul.u32.u64.low 3817748708, %v422_v48  ;;  %v985_v54 = vmul.u32.u64.high 3817748708, %v422_v48, %v984_v53  ;;  %p825_p10 = scmp.ne.s32.totalorder %s589_s1, %s824_s24  ;;  %p830_p12 = scmp.lt.s32.totalorder %s824_s24, %s824_s24 }
  0x2a   :  { %v94_v25 = vsel %vm82_vm2, %v89_v23, %v93_v21  ;;  %v987_v55 = vmul.u32.u64.low 3817748708, %v421_v49  ;;  %v988_v56 = vmul.u32.u64.high 3817748708, %v421_v49, %v987_v55  ;;  %v424_v57 = vadd.s32 32, %v975_v47 }
  0x2b   :  { %v991_v59 = vmul.u32.u64.low 3817748708, %v423_v52  ;;  %v992_v60 = vmul.u32.u64.high 3817748708, %v423_v52, %v991_v59  ;;  %v431_v3 = vshrl.u32 %v981_v51, 4  ;;  %v453_v6 = vshrl.u32 %v985_v54, 4  ;;  %p831_p13 = por %p830_p12, %p829_p11 }
  0x2c   :  { %675 = vmatpush3.bf16.msra.mxu0 %v770_v13  ;;  %697 = vmatpush3.bf16.msra.mxu1 %v771_v14  ;;  %v442_v8 = vshrl.u32 %v988_v56, 4 }
  0x2d   :  { %676 = vmatprep.subr.bf16.mxu0 %v876_v0  ;;  %698 = vmatprep.subr.bf16.mxu1 %v876_v0  ;;  %v432_v10 = vmul.u32 18, %v431_v3  ;;  %v454_v14 = vmul.u32 18, %v453_v6  ;;  %p832_p0 = pnand %p831_p13, %p825_p10 }
  0x2e   :  { %v443_v16 = vmul.u32 18, %v442_v8 }
  0x2f   :  { %v433_v19 = vsub.s32 %v975_v47, %v432_v10  ;;  %v455_v23 = vsub.s32 %v422_v48, %v454_v14 }
  0x30   :  { %677 = vmatpush3.bf16.msra.mxu0 %v772_v20  ;;  %699 = vmatpush3.bf16.msra.mxu1 %v773_v22 }
  0x31   :  { %712 = vmatprep.subr.bf16.mxu0 %v876_v0  ;;  %734 = vmatprep.subr.bf16.mxu1 %v876_v0  ;;  %vm480_vm5 = vcmp.ne.s32.totalorder %v433_v19, 0  ;;  %vm485_vm6 = vcmp.lt.s32.totalorder %v433_v19, 0  ;;  %v495_v31 = vadd.s32 18, %v433_v19  ;;  %vm482_vm7 = vcmp.ne.s32.totalorder %v455_v23, 0 }
  0x32   :  { %vm487_vm8 = vcmp.lt.s32.totalorder %v455_v23, 0  ;;  %vm1007_vm9 = vmand %vm485_vm6, %vm480_vm5  ;;  %v497_v36 = vadd.s32 18, %v455_v23 }
  0x33   :  { %679 = vmatmul.mubr.msk.bf16.vlgmr.msra.gmra.mxu0 %vm133_vm3, %v94_v25  ;;  %701 = vmatmul.mubr.msk.bf16.vlgmr.msra.gmra.mxu1 %vm133_vm3, %v615_v11  ;;  %v464_v11 = vshrl.u32 %v992_v60, 4  ;;  %v444_v25 = vsub.s32 %v421_v49, %v443_v16  ;;  %vm1011_vm14 = vmand %vm487_vm8, %vm482_vm7  ;;  %v500_v41 = vsel %vm1007_vm9, %v495_v31, %v433_v19  ;;  %vm563_vm7 = vcmask 1040384  }
  0x34   :  { %713 = vmatpush3.bf16.msra.mxu0 %v356_v28  ;;  %739 = vmatpush3.bf16.msra.mxu1 %v356_v28  ;;  %v502_v50 = vsel %vm1011_vm14, %v497_v36, %v455_v23  ;;  %vm529_vm9 = vcmask 1041408  }
  0x35   :  { %714 = vmatprep.subr.bf16.mxu0 %v876_v0  ;;  %735 = vmatprep.subr.bf16.mxu1 %v876_v0  ;;  %v465_v20 = vmul.u32 18, %v464_v11  ;;  %vm481_vm10 = vcmp.ne.s32.totalorder %v444_v25, 0  ;;  %vm486_vm11 = vcmp.lt.s32.totalorder %v444_v25, 0  ;;  %vm507_vm5 = vcmp.lt.s32.totalorder %v502_v50, 16 }
  0x36   :  { %682 = vmatprep.mubr.msk.bf16.mxu0 %vm877_vm0, %v876_v0  ;;  %704 = vmatprep.mubr.msk.bf16.mxu1 %vm877_vm0, %v876_v0  ;;  %vm1017_vm15 = vmand %vm486_vm11, %vm481_vm10 }
  0x37   :  { %v466_v28 = vsub.s32 %v423_v52, %v465_v20 }
  0x38   :  { %715 = vmatpush3.bf16.msra.mxu0 %v777_v29  ;;  %740 = vmatpush3.bf16.msra.mxu1 %v777_v29 }
  0x39   :  { %716 = vmatprep.subr.bf16.mxu0 %v876_v0  ;;  %736 = vmatprep.subr.bf16.mxu1 %v876_v0  ;;  %vm483_vm12 = vcmp.ne.s32.totalorder %v466_v28, 0  ;;  %vm488_vm13 = vcmp.lt.s32.totalorder %v466_v28, 0 }
  0x3b   :  { %683 = vmatmul.mubr.msk.bf16.gmra.mxu0 %vm133_vm3, %v102_v32  ;;  %705 = vmatmul.mubr.msk.bf16.gmra.mxu1 %vm133_vm3, %v923_v12 }
  0x3c   :  { %717 = vmatpush3.bf16.msra.mxu0 %v779_v33  ;;  %741 = vmatpush3.bf16.msra.mxu1 %v779_v33 }
  0x3d   :  { %686 = vmatprep.mubr.msk.bf16.mxu0 %vm877_vm0, %v876_v0  ;;  %708 = vmatprep.mubr.msk.bf16.mxu1 %vm877_vm0, %v876_v0 }
  0x3e   :  { %718 = vmatprep.subr.bf16.mxu0 %v876_v0  ;;  %737 = vmatprep.subr.bf16.mxu1 %v876_v0 }
  0x40   :  { %719 = vmatpush3.bf16.msra.mxu0 %v781_v35  ;;  %742 = vmatpush3.bf16.msra.mxu1 %v781_v35 }
  0x41   :  { %720 = vmatprep.subr.bf16.mxu0 %v876_v0  ;;  %738 = vmatprep.subr.bf16.mxu1 %v876_v0 }
  0x43   :  { %687 = vmatmul.mubr.msk.bf16.gmra.mxu0 %vm133_vm3, %v105_v37  ;;  %709 = vmatmul.mubr.msk.bf16.gmra.mxu1 %vm133_vm3, %v780_v38 }
  0x44   :  { %721 = vmatpush3.bf16.msra.mxu0 %v782_v39  ;;  %743 = vmatpush3.bf16.msra.mxu1 %v782_v39  ;;  %v496_v39 = vadd.s32 18, %v444_v25 }
  0x45   :  { %722 = vmatprep.mubr.msk.bf16.mxu0 %vm877_vm0, %v876_v0  ;;  %726 = vmatprep.mubr.msk.bf16.mxu1 %vm877_vm0, %v876_v0 }
  0x46   :  { %v501_v53 = vsel %vm1017_vm15, %v496_v39, %v444_v25 }
  0x47   :  { %vm506_vm6 = vcmp.lt.s32.totalorder %v501_v53, 16 }
  0x4b   :  { %723 = vmatmul.mubr.msk.bf16.vlgmr.msra.gmra.mxu0 %vm133_vm3, %v316_v44  ;;  %727 = vmatmul.mubr.msk.bf16.vlgmr.msra.gmra.mxu1 %vm133_vm3, %v318_v45 }
  0x4c   :  { %730 = vmatprep.mubr.msk.bf16.mxu1 %vm877_vm0, %v876_v0  ;;  %v994_v0 = vmul.u32.u64.low 3817748708, %v424_v57  ;;  %v995_v1 = vmul.u32.u64.high 3817748708, %v424_v57, %v994_v0  ;;  %vm1021_vm0 = vmand %vm488_vm13, %vm483_vm12 }
  0x4e   :  { %v475_v17 = vshrl.u32 %v995_v1, 4 }
  0x50   :  { %v476_v26 = vmul.u32 18, %v475_v17 }
  0x52   :  { %v477_v34 = vsub.s32 %v424_v57, %v476_v26 }
  0x53   :  { %731 = vmatmul.mubr.msk.bf16.gmra.mxu1 %vm133_vm3, %v317_v43  ;;  %v498_v43 = vadd.s32 18, %v466_v28  ;;  %vm505_vm3 = vcmp.lt.s32.totalorder %v500_v41, 16 }
  0x54   :  { %vm484_vm1 = vcmp.ne.s32.totalorder %v477_v34, 0  ;;  %vm489_vm2 = vcmp.lt.s32.totalorder %v477_v34, 0  ;;  %v499_v54 = vadd.s32 18, %v477_v34 }
  0x55   :  { %v503_v57 = vsel %vm1021_vm0, %v498_v43, %v466_v28  ;;  %vm1031_vm4 = vmand %vm489_vm2, %vm484_vm1 }
  0x56   :  { %vm508_vm8 = vcmp.lt.s32.totalorder %v503_v57, 16 }
  0xf3   :  { %v181_v58 = vpop.f32.mrf.mxu0  ;;  %v277_v61 = vpop.f32.mrf.mxu1 }
  0xf4   :  { %v278_v44 = vadd.f32 %v277_v61, %v181_v58 }
  0xf5   :  { %v680_v62 = vpop.f32.mrf.mxu0  ;;  %v702_v63 = vpop.f32.mrf.mxu1 }
  0xf7   :  { %v997_v2 = vpop.f32.mrf.mxu0  ;;  %v1000_v4 = vpop.f32.mrf.mxu1 }
  0xf8   :  { %v281_v59 = vadd.f32 %v1000_v4, %v997_v2 }
  0xf9   :  { %v681_v5 = vpop.f32.mrf.mxu0  ;;  %v703_v7 = vpop.f32.mrf.mxu1 }
  0xfa   :  { %v504_v5 = vsel %vm1031_vm4, %v499_v54, %v477_v34 }
  0xfb   :  { %v189_v9 = vpop.f32.mrf.mxu0  ;;  %v285_v12 = vpop.f32.mrf.mxu1  ;;  %vm509_vm10 = vcmp.lt.s32.totalorder %v504_v5, 16 }
  0xfc   :  { %v286_v48 = vadd.f32 %v285_v12, %v189_v9 }
  0xfd   :  { %v684_v13 = vpop.f32.mrf.mxu0  ;;  %v706_v15 = vpop.f32.mrf.mxu1 }
  0xff   :  { %v192_v18 = vpop.f32.mrf.mxu0  ;;  %v288_v21 = vpop.f32.mrf.mxu1 }
 0x100   :  { %v289_v62 = vadd.f32 %v288_v21, %v192_v18 }
 0x101   :  { %v685_v22 = vpop.f32.mrf.mxu0  ;;  %v707_v24 = vpop.f32.mrf.mxu1 }
 0x103   :  { %v197_v27 = vpop.f32.mrf.mxu0  ;;  %v293_v29 = vpop.f32.mrf.mxu1 }
 0x104   :  { %v294_v6 = vadd.f32 %v293_v29, %v197_v27 }
 0x105   :  { %v688_v30 = vpop.f32.mrf.mxu0  ;;  %v710_v32 = vpop.f32.mrf.mxu1 }
 0x107   :  { %v200_v35 = vpop.f32.mrf.mxu0  ;;  %v296_v37 = vpop.f32.mrf.mxu1 }
 0x109   :  { %v689_v40 = vpop.f32.mrf.mxu0  ;;  %v711_v45 = vpop.f32.mrf.mxu1 }
 0x10b   :  { %v392_v49 = vpop.f32.mrf.mxu0  ;;  %v400_v52 = vpop.f32.mrf.mxu1 }
 0x10c   :  { %v414_v51 = vadd.f32 %v392_v49, %v278_v44  ;;  %v416_v55 = vadd.f32 %v400_v52, %v286_v48 }
 0x10d   :  { %v724_v56 = vpop.f32.mrf.mxu0  ;;  %v728_v61 = vpop.f32.mrf.mxu1 }
 0x10e   :  { %v564_v60 = vrot.slane %v414_v51, 7  ;;  %v520_v63 = vsel %vm505_vm3, %v414_v51, 0.0  ;;  %v522_v7 = vsel %vm507_vm5, %v416_v55, 0.0  ;;  %v567_v4 = vrot.slane %v416_v55, 7 }
 0x10f   :  { %v395_v0 = vpop.f32.mrf.mxu0  ;;  %v403_v3 = vpop.f32.mrf.mxu1  ;;  %v538_v2 = vmul.f32 %v520_v63, %v520_v63  ;;  %v540_v17 = vmul.f32 %v522_v7, %v522_v7 }
 0x110   :  { %578 = vst [vmem:[#allocation7] sm:$0xfe] %v564_v60  ;;  %v415_v1 = vadd.f32 %v395_v0, %v281_v59  ;;  %v417_v8 = vadd.f32 %v403_v3, %v289_v62 }
 0x111   :  { %v725_v9 = vpop.f32.mrf.mxu0  ;;  %v729_v12 = vpop.f32.mrf.mxu1 }
 0x112   :  { %v521_v10 = vsel %vm506_vm6, %v415_v1, 0.0  ;;  %v565_v11 = vrot.slane %v415_v1, 7  ;;  %v523_v15 = vsel %vm508_vm8, %v417_v8, 0.0  ;;  %v569_v16 = vrot.slane %v417_v8, 7 }
 0x113   :  { %v526_v13 = vadd.f32 %v521_v10, %v520_v63  ;;  %v539_v14 = vmul.f32 %v521_v10, %v521_v10  ;;  %v408_v20 = vpop.f32.mrf.mxu1  ;;  %v541_v25 = vmul.f32 %v523_v15, %v523_v15 }
 0x114   :  { %v566_v18 = vsel %vm563_vm7, %v564_v60, %v565_v11  ;;  %v568_v19 = vsel %vm563_vm7, %v565_v11, %v567_v4  ;;  %v570_v23 = vsel %vm563_vm7, %v567_v4, %v569_v16  ;;  %v418_v24 = vadd.f32 %v408_v20, %v294_v6 }
 0x115   :  { %v543_v21 = vadd.f32 %v539_v14, %v538_v2  ;;  %579 = vst [vmem:[#allocation7 + $0x10] sm:$0xff] %v566_v18  ;;  %580 = vst [vmem:[#allocation7 + $0x20] sm:$0xff] %v568_v19  ;;  %v527_v22 = vadd.f32 %v526_v13, %v522_v7  ;;  %v732_v26 = vpop.f32.mrf.mxu1 }
 0x116   :  { %581 = vst [vmem:[#allocation7 + $0x30] sm:$0xff] %v570_v23  ;;  %v524_v29 = vsel %vm509_vm10, %v418_v24, 0.0  ;;  %v571_v30 = vrot.slane %v418_v24, 7 }
 0x117   :  { %v528_v27 = vadd.f32 %v527_v22, %v523_v15  ;;  %v544_v28 = vadd.f32 %v543_v21, %v540_v17  ;;  %v530_v31 = vsel %vm529_vm9, %v524_v29, 0.0  ;;  %v542_v32 = vmul.f32 %v524_v29, %v524_v29  ;;  %v411_v33 = vpop.f32.mrf.mxu1 }
 0x118   :  { %v572_v36 = vsel %vm563_vm7, %v569_v16, %v571_v30 }
 0x119   :  { %v545_v34 = vadd.f32 %v544_v28, %v541_v25  ;;  %v531_v35 = vadd.f32 %v530_v31, %v528_v27  ;;  %v546_v37 = vsel %vm529_vm9, %v542_v32, 0.0  ;;  %582 = vst [vmem:[#allocation7 + $0x40] sm:$0x7] %v572_v36  ;;  %v733_v38 = vpop.f32.mrf.mxu1 }
 0x11b   :  { %v532_v39 = vrot.slane %v531_v35, 4  ;;  %v547_v40 = vadd.f32 %v546_v37, %v545_v34 }
 0x11c   :  { %835 = shalt.err (!%p832_p0)
}
 0x11d   :  { %s879_s25 = smov 256   ;;  %s880_s26 = smov 16   ;;  %v533_v41 = vadd.f32 %v532_v39, %v531_v35  ;;  %v548_v42 = vrot.slane %v547_v40, 4  ;;  %vm525_vm11 = vcmp.eq.s32.totalorder %v975_v47, 0 }
 0x11e   :  { %594 = dma.vmem_to_hbm [thread:$0]  %s589_s1, 1280, %s1054_s2, [#allocation4], %s879_s25, %s879_s25, %s880_s26  }
 0x11f   :  { %v534_v43 = vrot.slane %v533_v41, 2  ;;  %v549_v44 = vadd.f32 %v548_v42, %v547_v40  ;;  %s881_s29 = smov [#allocation8]  }
 0x120   :  { %s601_s30 = sshll.u32 %s881_s29, 4  ;;  %s602_s30 = int_to_ptr.vmem [resolvable:$true] %s601_s30 }
 0x121   :  { %v535_v45 = vadd.f32 %v534_v43, %v533_v41  ;;  %v550_v46 = vrot.slane %v549_v44, 2  ;;  %s844_s4 = scalar_lea.vmem %s602_s30, 32  ;;  %p849_p2 = scmp.lt.s32.totalorder %s602_s30, %s602_s30 }
 0x122   :  { %p845_p1 = scmp.ne.s32.totalorder %s602_s30, %s844_s4  ;;  %p850_p3 = scmp.lt.s32.totalorder %s844_s4, %s844_s4 }
 0x123   :  { %v536_v48 = vrot.slane %v535_v45, 1  ;;  %v551_v49 = vadd.f32 %v550_v46, %v549_v44 }
 0x124   :  { %p851_p4 = por %p850_p3, %p849_p2 }
 0x125   :  { %v552_v50 = vrot.slane %v551_v49, 1  ;;  %v537_v51 = vadd.f32 %v536_v48, %v535_v45 }
 0x126   :  { %p852_p5 = pnand %p851_p4, %p845_p1 }
 0x127   :  { %v553_v52 = vadd.f32 %v552_v50, %v551_v49 }
 0x129   :  { %v556_v53 = vsel %vm525_vm11, %v537_v51, %v553_v52 }
 0x12a   :  { %557 = vst [vmem:[#allocation8] sm:$0x3] %v556_v53 }
 0x12b   :  { %855 = shalt.err (!%p852_p5)
}
 0x12c   :  { %604 = dma.vmem_to_hbm [thread:$0]  %s602_s30, 32, %s1055_s3, [#allocation9]  }
 0x12d   :  { %868 = dma.done.wait [#allocation4], 1280  }
 0x12e   :  { %869 = vsyncadd [#allocation4], 4294966016 }
 0x12f   :  { %870 = dma.done.wait [#allocation9], 32  }
 0x130   :  { %871 = vsyncadd [#allocation9], 4294967264 }
 0x131   :  { %611 = vsyncpa [#allocation3], 1 }
 0x132   :  { %612 = vsyncpa [#allocation6], 1 }
 0x133   :  { %613 = vsyncpa [#allocation4], 1 }
 0x134   :  { %614 = vsyncpa [#allocation9], 1 }

</bundles_post_ra>
